<compile_context>
chip_gen: v7x
topology: tpu7x:2x2x1
jax: 0.10.0
libtpu: 0.0.40
codegen_flags: <defaults>
</compile_context>

<pallas_src>
import jax
import jax.numpy as jnp
from jax import lax
from jax.experimental import pallas as pl
from jax.experimental.pallas import tpu as pltpu

F32_MIN = float(jnp.finfo(jnp.float32).min)   # torch.finfo(dtype).min
SIM_THRESHOLD = 0.2                           # self.similarity_threshold
_EPS = 1e-12


def _matmul_nt(a, b):
    """a @ b.T with the transpose folded into the MXU contraction (f32 accumulate)."""
    return lax.dot_general(a, b, (((1,), (1,)), ((), ())),
                           preferred_element_type=jnp.float32)


def _l2norm(x):
    """F.normalize(dim=-1) with an eps guard on the norm."""
    n = jnp.sqrt(jnp.sum(x * x, axis=-1, keepdims=True))
    return x / jnp.maximum(n, _EPS)


# ---------------------------------------------------------------------------
# Kernel A (fused): vision/text CLS projection + L2-normalize + ITA loss
# ---------------------------------------------------------------------------
def _ita_fused_kernel(icls_ref, tcls_ref, vw_ref, vb_ref, tw_ref, tb_ref,
                      inv_t_ref, loss_ita_ref, loss_i2t_ref):
    inv_t = inv_t_ref[0]                               # scalar 1/temp from SMEM

    # bf16 operands straight off the refs -> bf16 MXU rate, f32 accumulate.
    # Projected embeddings stay in VMEM/vregs - never stored to HBM.
    v = jnp.dot(icls_ref[...], vw_ref[...],
                preferred_element_type=jnp.float32) + vb_ref[...]
    l = jnp.dot(tcls_ref[...], tw_ref[...],
                preferred_element_type=jnp.float32) + tb_ref[...]
    v = _l2norm(v)                                     # (B, E) f32
    l = _l2norm(l)                                     # (B, E) f32
    Bn = v.shape[0]

    # Diagonal (matching pairs) computed directly on the VPU -- no (B,B) eye/iota.
    diag = jnp.sum(v * l, axis=-1, keepdims=True) * inv_t     # (B, 1): sim[i, i]
    trace = jnp.sum(diag, keepdims=True)                      # (1, 1)

    # Single MXU matmul (bf16 operands, f32 acc): sim == sim_i2t, sim_t2i == sim.T,
    # so the t2i loss comes from column-wise reductions of the same tile.
    sim = _matmul_nt(v.astype(jnp.bfloat16), l.astype(jnp.bfloat16)) * inv_t  # (B, B)

    # Row-wise logsumexp -> loss_i2t ; column-wise logsumexp -> loss_t2i.
    m_r = jnp.max(sim, axis=1, keepdims=True)
    lse_r = m_r + jnp.log(jnp.sum(jnp.exp(sim - m_r), axis=1, keepdims=True))
    m_c = jnp.max(sim, axis=0, keepdims=True)
    lse_c = m_c + jnp.log(jnp.sum(jnp.exp(sim - m_c), axis=0, keepdims=True))

    # -sum(log_softmax * eye, dim=1).mean() == mean_i(lse_i - sim[i,i])
    li2t = (jnp.sum(lse_r, keepdims=True) - trace) / Bn       # (1,1)
    lt2i = (jnp.sum(lse_c, keepdims=True) - trace) / Bn       # (1,1)
    loss_i2t_ref[...] = li2t
    loss_ita_ref[...] = 0.5 * (li2t + lt2i)


def ita_fused_loss(img_cls, txt_cls, vproj_w, vproj_b, tproj_w, tproj_b, temp):
    # TODO(synk): if B grows large (e.g. gathered embeddings) on v7x (64 MiB VMEM),
    # switch this single-shot kernel to a row-blocked grid with online logsumexp.
    E = vproj_w.shape[1]
    # temp.clamp_(0.001, 0.5); pass the reciprocal so the kernel multiplies (VPU)
    # instead of dividing a whole tile.
    inv_t = jnp.reshape(1.0 / jnp.clip(jnp.asarray(temp, jnp.float32), 0.001, 0.5), (1,))
    cdt = jnp.bfloat16

    vmem = pl.BlockSpec(memory_space=pltpu.MemorySpace.VMEM)
    smem = pl.BlockSpec(memory_space=pltpu.MemorySpace.SMEM)
    loss_ita, loss_i2t = pl.pallas_call(
        _ita_fused_kernel,
        out_shape=(jax.ShapeDtypeStruct((1, 1), jnp.float32),
                   jax.ShapeDtypeStruct((1, 1), jnp.float32)),
        in_specs=[vmem, vmem, vmem, vmem, vmem, vmem, smem],
        out_specs=(vmem, vmem),
    )(img_cls.astype(cdt), txt_cls.astype(cdt),
      vproj_w.astype(cdt), vproj_b.reshape(1, E).astype(jnp.float32),
      tproj_w.astype(cdt), tproj_b.reshape(1, E).astype(jnp.float32),
      inv_t)
    return loss_ita[0, 0], loss_i2t[0, 0]


# ---------------------------------------------------------------------------
# Kernel B: fine-grained token<->patch alignment loss
#   - batch-blocked "parallel" grid, bf16 inputs, f32 accumulation on the MXU
#   - per-block partial (loss_sum, count) reduced in the wrapper
# ---------------------------------------------------------------------------
def _token_align_kernel(lt_ref, vp_ref, mrow_ref, mcol_ref, inv_tt_ref,
                        loss_ref, cnt_ref):
    lt = lt_ref[...]                            # (BB, Tm, D) bf16 text token embeds
    vp = vp_ref[...]                            # (BB, P,  D) bf16 image patch embeds
    mrow = mrow_ref[...]                        # (BB, Tm, 1) f32 language mask
    mcol = mcol_ref[...]                        # (BB, 1, Tm) f32 language mask
    inv_tt = inv_tt_ref[0]                      # scalar 1/temp_token from SMEM

    # similarity = einsum('btd,bpd->btp'): bf16 operands, f32 accumulate.  Same NT
    # pattern as the canonical flash-attention kernel (no explicit vp transpose).
    sim = jnp.einsum('btd,bpd->btp', lt, vp,
                     preferred_element_type=jnp.float32)          # (BB, Tm, P) f32
    smin = jnp.min(sim, axis=-1, keepdims=True)
    smax = jnp.max(sim, axis=-1, keepdims=True)
    # eps guards: reference divides unguarded -> NaN on constant/all-zero rows
    # (e.g. batch-padding rows); guarded rows are masked out of the loss anyway.
    simn = (sim - smin) / jnp.maximum(smax - smin, _EPS)
    simn = jnp.where(simn < SIM_THRESHOLD, 0.0, simn)
    w = simn / jnp.maximum(jnp.sum(simn, axis=-1, keepdims=True), _EPS)

    grouped = jnp.einsum('btp,bpd->btd', w.astype(lt.dtype), vp,
                         preferred_element_type=jnp.float32)      # (BB, Tm, D) f32
    grouped = _l2norm(grouped)
    ltn = _l2norm(lt.astype(jnp.float32))                         # small upcast only

    # token-level t2i similarity; only the COLUMN mask is applied here -- the row
    # mask is folded into the loss sum below, so the full (BB,Tm,Tm) valid2d mask,
    # eye/iota tensors and the -logp*eye*valid2d product are never materialized.
    sim_t2i = jnp.einsum('bmd,bnd->bmn', ltn, grouped,
                         preferred_element_type=jnp.float32) * inv_tt  # (BB,Tm,Tm)
    sim_t2i = jnp.where(mcol > 0.0, sim_t2i, F32_MIN)

    m = jnp.max(sim_t2i, axis=-1, keepdims=True)
    lse = m + jnp.log(jnp.sum(jnp.exp(sim_t2i - m), axis=-1, keepdims=True))  # (BB,Tm,1)
    diag = jnp.sum(ltn * grouped, axis=-1, keepdims=True) * inv_tt            # (BB,Tm,1)

    # loss_token_t2i[unpadded_2d_mask].mean()
    #   == sum_{b,m} mask[b,m]*(lse[b,m]-diag[b,m]) / sum_b (rowsum_b)^2
    loss_ref[...] = jnp.sum((lse - diag) * mrow, keepdims=True)   # (1,1,1) partial
    rs = jnp.sum(mrow, axis=1, keepdims=True)                     # (BB,1,1) rowsums
    cnt_ref[...] = jnp.sum(rs * rs, keepdims=True)                # (1,1,1) partial


def token_align_t2i_loss(l_token, v_patch, lang_mask, temp_token, block_b=8):
    Bn, Tm, D = l_token.shape
    P = v_patch.shape[1]

    # Cast the big sequence tensors ONCE in the wrapper (halves HBM DMA bytes);
    # the kernel consumes them directly in bf16 (f32 accumulate on the MXU).
    if l_token.dtype != jnp.bfloat16:
        l_token = l_token.astype(jnp.bfloat16)
    if v_patch.dtype != jnp.bfloat16:
        v_patch = v_patch.astype(jnp.bfloat16)

    # Batch block size.  block_b is the per-generation knob: ~4-8 on v5e/v7x,
    # 16 on v6e (128 MiB VMEM).  Ensure >= 2 grid steps so the "parallel" axis
    # can use both v7x TensorCores.
    BB = max(1, min(block_b, Bn))
    if Bn > 1 and pl.cdiv(Bn, BB) < 2:
        BB = pl.cdiv(Bn, 2)
    nb = pl.cdiv(Bn, BB)
    Bpad = nb * BB
    if Bpad != Bn:
        # zero-pad the batch; padded rows have mask==0 and contribute 0 to both
        # loss_sum and count (eps guards keep them NaN-free).
        l_token = jnp.pad(l_token, ((0, Bpad - Bn), (0, 0), (0, 0)))
        v_patch = jnp.pad(v_patch, ((0, Bpad - Bn), (0, 0), (0, 0)))
        lang_mask = jnp.pad(lang_mask, ((0, Bpad - Bn), (0, 0)))

    # Pre-shape the (tiny) mask views in the wrapper so the kernel only does
    # unit-dim broadcasts (no in-kernel sublane<->lane relayout).
    maskf = lang_mask.astype(jnp.float32)
    mrow = maskf.reshape(Bpad, Tm, 1)
    mcol = maskf.reshape(Bpad, 1, Tm)
    inv_tt = jnp.reshape(1.0 / jnp.asarray(temp_token, jnp.float32), (1,))

    # Explicit scoped-VMEM budget: 2x double-buffered bf16 input blocks + f32
    # intermediates (+ headroom), floored above the 16/32 MiB defaults and capped
    # at v7x's 64 MiB physical VMEM.
    in_bytes = 2  # bf16
    blk_in = BB * ((Tm * D + P * D) * in_bytes + 2 * Tm * 4)
    interm = BB * (4 * Tm * P * 4 + 3 * Tm * D * 4 + 3 * Tm * Tm * 4)
    vmem_limit = int(2 * blk_in + 1.5 * interm) + (4 << 20)
    vmem_limit = min(max(vmem_limit, 32 << 20), 64 << 20)

    smem = pl.BlockSpec(memory_space=pltpu.MemorySpace.SMEM)
    loss_sum, count = pl.pallas_call(
        _token_align_kernel,
        out_shape=(jax.ShapeDtypeStruct((nb, 1, 1), jnp.float32),
                   jax.ShapeDtypeStruct((nb, 1, 1), jnp.float32)),
        grid=(nb,),
        in_specs=[
            pl.BlockSpec((BB, Tm, D), lambda b: (b, 0, 0)),
            pl.BlockSpec((BB, P, D), lambda b: (b, 0, 0)),
            pl.BlockSpec((BB, Tm, 1), lambda b: (b, 0, 0)),
            pl.BlockSpec((BB, 1, Tm), lambda b: (b, 0, 0)),
            smem,
        ],
        out_specs=(pl.BlockSpec((1, 1, 1), lambda b: (b, 0, 0)),
                   pl.BlockSpec((1, 1, 1), lambda b: (b, 0, 0))),
        compiler_params=pltpu.CompilerParams(
            dimension_semantics=("parallel",),      # independent blocks -> both v7x TCs
            vmem_limit_bytes=vmem_limit),
    )(l_token, v_patch, mrow, mcol, inv_tt)
    return jnp.sum(loss_sum) / jnp.sum(count)


# ---------------------------------------------------------------------------
# Forward pass (glue + kernels)
# ---------------------------------------------------------------------------
def blip_retrieval_forward(params, image, token_ids, attn_mask, idx):
    del idx  # this variant uses hard eye targets; idx only feeds queue ops / gather
    B, C, H, W = image.shape
    p = params["patch_size"]
    D = params["patch_w"].shape[1]

    # ---- visual encoder stub ----
    # TODO(synk): full ViT backbone (patch conv + transformer blocks) is an external
    # submodule; replaced by a deterministic linear patch-embedding stub.
    x = image.reshape(B, C, H // p, p, W // p, p)
    x = x.transpose(0, 2, 4, 1, 3, 5).reshape(B, (H // p) * (W // p), C * p * p)
    patch_tokens = x @ params["patch_w"] + params["patch_b"]
    cls = jnp.broadcast_to(params["cls_token"].reshape(1, 1, D), (B, 1, D))
    image_embeds = jnp.concatenate([cls, patch_tokens], axis=1)        # (B, P+1, D)

    # ---- text encoder stub ----
    # TODO(synk): HF tokenizer + BERT text encoder are external submodules; replaced by
    # a deterministic embedding-table stub operating on pre-tokenized ids.
    T = token_ids.shape[1]
    text_hidden = params["tok_emb"][token_ids] + params["pos_emb"][None, :T, :]  # (B, T, D)

    # ---- fused projection + L2-normalize + ITA contrastive loss (Pallas kernel A) ----
    loss_ita, loss_i2t = ita_fused_loss(
        image_embeds[:, 0, :], text_hidden[:, 0, :],
        params["vision_proj_w"], params["vision_proj_b"],
        params["text_proj_w"], params["text_proj_b"],
        params["temp"])

    # ---- fine-grained token-alignment loss (Pallas kernel B, batch-blocked grid) ----
    l_token = text_hidden[:, 1:, :]
    v_patch = image_embeds[:, 1:, :]
    lang_mask = attn_mask[:, 1:]
    loss_token_t2i = token_align_t2i_loss(l_token, v_patch, lang_mask, params["temp_token"])

    # NOTE: the reference code overwrites loss_token_i2t with loss_i2t.mean();
    # reproduced exactly here.
    loss_token_i2t = loss_i2t
    loss_token_ita = 0.5 * (loss_token_i2t + loss_token_t2i)
    return loss_ita, loss_token_ita


if __name__ == "__main__":
    key = jax.random.PRNGKey(0)
    B, C, H, W = 4, 3, 16, 16
    patch = 4
    D = 32     # vision_width == text_width (hidden size)
    E = 16     # embed_dim (projection dim)
    T = 8      # tokenized caption length (incl. [CLS]); stand-in for max_length=35
    V = 64     # stub vocab size

    ks = jax.random.split(key, 12)
    image = jax.random.normal(ks[0], (B, C, H, W), jnp.float32)
    token_ids = jax.random.randint(ks[1], (B, T), 0, V)
    lengths = jnp.array([T, 6, 5, 3], dtype=jnp.int32)
    attn_mask = (jnp.arange(T)[None, :] < lengths[:, None]).astype(jnp.float32)
    idx = jnp.arange(B, dtype=jnp.int32)

    params = {
        "patch_size": patch,
        "patch_w": 0.05 * jax.random.normal(ks[2], (C * patch * patch, D), jnp.float32),
        "patch_b": 0.01 * jax.random.normal(ks[3], (D,), jnp.float32),
        "cls_token": 0.05 * jax.random.normal(ks[4], (D,), jnp.float32),
        "tok_emb": 0.05 * jax.random.normal(ks[5], (V, D), jnp.float32),
        "pos_emb": 0.05 * jax.random.normal(ks[6], (T, D), jnp.float32),
        "vision_proj_w": 0.05 * jax.random.normal(ks[7], (D, E), jnp.float32),
        "vision_proj_b": 0.01 * jax.random.normal(ks[8], (E,), jnp.float32),
        "text_proj_w": 0.05 * jax.random.normal(ks[9], (D, E), jnp.float32),
        "text_proj_b": 0.01 * jax.random.normal(ks[10], (E,), jnp.float32),
        "temp": jnp.float32(0.07),
        "temp_token": jnp.float32(0.07),
    }

    loss_ita, loss_token_ita = blip_retrieval_forward(params, image, token_ids, attn_mask, idx)
    jax.block_until_ready((loss_ita, loss_token_ita))
    assert bool(jnp.isfinite(loss_ita)) and bool(jnp.isfinite(loss_token_ita))
    print("KERNEL_OK")
</pallas_src>

<mosaic_0001>
module attributes {stable_mosaic.version = 11 : i64} {
  func.func @_ita_fused_kernel(%arg0: memref<4x32xbf16, #tpu.memory_space<vmem>>, %arg1: memref<4x32xbf16, #tpu.memory_space<vmem>>, %arg2: memref<32x16xbf16, #tpu.memory_space<vmem>>, %arg3: memref<1x16xf32, #tpu.memory_space<vmem>>, %arg4: memref<32x16xbf16, #tpu.memory_space<vmem>>, %arg5: memref<1x16xf32, #tpu.memory_space<vmem>>, %arg6: memref<1xf32, #tpu.memory_space<smem>>, %arg7: memref<1x1xf32, #tpu.memory_space<vmem>>, %arg8: memref<1x1xf32, #tpu.memory_space<vmem>>) attributes {dimension_semantics = [], scalar_prefetch = 0 : i64, scratch_operands = 0 : i64, tpu.core_type = #tpu.core_type<tc>} {
    %c0 = arith.constant 0 : index
    %0 = memref.load %arg6[%c0] : memref<1xf32, #tpu.memory_space<smem>>
    %c0_0 = arith.constant 0 : index
    %c0_1 = arith.constant 0 : index
    %1 = vector.load %arg0[%c0_0, %c0_1] : memref<4x32xbf16, #tpu.memory_space<vmem>>, vector<4x32xbf16>
    %c0_2 = arith.constant 0 : index
    %c0_3 = arith.constant 0 : index
    %2 = vector.load %arg2[%c0_2, %c0_3] : memref<32x16xbf16, #tpu.memory_space<vmem>>, vector<32x16xbf16>
    %cst = arith.constant dense<0.000000e+00> : vector<4x16xf32>
    %3 = tpu.matmul %1, %2, %cst {dimension_numbers = #tpu.dot_dimension_numbers<[1], [0], [0], [1], [0, 0, 1, 1], [], []>} : vector<4x32xbf16>, vector<32x16xbf16>, vector<4x16xf32> -> vector<4x16xf32>
    %c0_4 = arith.constant 0 : index
    %c0_5 = arith.constant 0 : index
    %4 = vector.load %arg3[%c0_4, %c0_5] : memref<1x16xf32, #tpu.memory_space<vmem>>, vector<1x16xf32>
    %5 = vector.broadcast %4 : vector<1x16xf32> to vector<4x16xf32>
    %6 = arith.addf %3, %5 : vector<4x16xf32>
    %c0_6 = arith.constant 0 : index
    %c0_7 = arith.constant 0 : index
    %7 = vector.load %arg1[%c0_6, %c0_7] : memref<4x32xbf16, #tpu.memory_space<vmem>>, vector<4x32xbf16>
    %c0_8 = arith.constant 0 : index
    %c0_9 = arith.constant 0 : index
    %8 = vector.load %arg4[%c0_8, %c0_9] : memref<32x16xbf16, #tpu.memory_space<vmem>>, vector<32x16xbf16>
    %cst_10 = arith.constant dense<0.000000e+00> : vector<4x16xf32>
    %9 = tpu.matmul %7, %8, %cst_10 {dimension_numbers = #tpu.dot_dimension_numbers<[1], [0], [0], [1], [0, 0, 1, 1], [], []>} : vector<4x32xbf16>, vector<32x16xbf16>, vector<4x16xf32> -> vector<4x16xf32>
    %c0_11 = arith.constant 0 : index
    %c0_12 = arith.constant 0 : index
    %10 = vector.load %arg5[%c0_11, %c0_12] : memref<1x16xf32, #tpu.memory_space<vmem>>, vector<1x16xf32>
    %11 = vector.broadcast %10 : vector<1x16xf32> to vector<4x16xf32>
    %12 = arith.addf %9, %11 : vector<4x16xf32>
    %13 = arith.mulf %6, %6 : vector<4x16xf32>
    %cst_13 = arith.constant dense<0.000000e+00> : vector<4xf32>
    %14 = vector.multi_reduction <add>, %13, %cst_13 [1] : vector<4x16xf32> to vector<4xf32>
    %15 = vector.shape_cast %14 : vector<4xf32> to vector<4x1xf32>
    %16 = math.sqrt %15 : vector<4x1xf32>
    %cst_14 = arith.constant 9.99999996E-13 : f32
    %17 = vector.broadcast %cst_14 : f32 to vector<4x1xf32>
    %18 = arith.maximumf %16, %17 : vector<4x1xf32>
    %19 = vector.broadcast %18 : vector<4x1xf32> to vector<4x16xf32>
    %20 = arith.divf %6, %19 : vector<4x16xf32>
    %21 = arith.mulf %12, %12 : vector<4x16xf32>
    %cst_15 = arith.constant dense<0.000000e+00> : vector<4xf32>
    %22 = vector.multi_reduction <add>, %21, %cst_15 [1] : vector<4x16xf32> to vector<4xf32>
    %23 = vector.shape_cast %22 : vector<4xf32> to vector<4x1xf32>
    %24 = math.sqrt %23 : vector<4x1xf32>
    %cst_16 = arith.constant 9.99999996E-13 : f32
    %25 = vector.broadcast %cst_16 : f32 to vector<4x1xf32>
    %26 = arith.maximumf %24, %25 : vector<4x1xf32>
    %27 = vector.broadcast %26 : vector<4x1xf32> to vector<4x16xf32>
    %28 = arith.divf %12, %27 : vector<4x16xf32>
    %29 = arith.mulf %20, %28 : vector<4x16xf32>
    %cst_17 = arith.constant dense<0.000000e+00> : vector<4xf32>
    %30 = vector.multi_reduction <add>, %29, %cst_17 [1] : vector<4x16xf32> to vector<4xf32>
    %31 = vector.shape_cast %30 : vector<4xf32> to vector<4x1xf32>
    %32 = vector.broadcast %0 : f32 to vector<4x1xf32>
    %33 = arith.mulf %31, %32 : vector<4x1xf32>
    %34 = vector.shape_cast %33 : vector<4x1xf32> to vector<1x4x1xf32>
    %cst_18 = arith.constant dense<0.000000e+00> : vector<1xf32>
    %35 = vector.multi_reduction <add>, %34, %cst_18 [1, 2] : vector<1x4x1xf32> to vector<1xf32>
    %36 = vector.shape_cast %35 : vector<1xf32> to vector<1x1x1xf32>
    %37 = vector.extract %36[0, 0, 0] : f32 from vector<1x1x1xf32>
    %38 = vector.broadcast %37 : f32 to vector<1x1xf32>
    %39 = arith.truncf %20 : vector<4x16xf32> to vector<4x16xbf16>
    %40 = arith.truncf %28 : vector<4x16xf32> to vector<4x16xbf16>
    %cst_19 = arith.constant dense<0.000000e+00> : vector<4x4xf32>
    %41 = tpu.matmul %39, %40, %cst_19 {dimension_numbers = #tpu.dot_dimension_numbers<[1], [1], [0], [0], [0, 0, 1, 0], [], []>} : vector<4x16xbf16>, vector<4x16xbf16>, vector<4x4xf32> -> vector<4x4xf32>
    %42 = vector.broadcast %0 : f32 to vector<4x4xf32>
    %43 = arith.mulf %41, %42 : vector<4x4xf32>
    %cst_20 = arith.constant dense<0xFF800000> : vector<4xf32>
    %44 = vector.multi_reduction <maximumf>, %43, %cst_20 [1] : vector<4x4xf32> to vector<4xf32>
    %45 = vector.shape_cast %44 : vector<4xf32> to vector<4x1xf32>
    %46 = vector.broadcast %45 : vector<4x1xf32> to vector<4x4xf32>
    %47 = arith.subf %43, %46 : vector<4x4xf32>
    %48 = math.exp %47 : vector<4x4xf32>
    %cst_21 = arith.constant dense<0.000000e+00> : vector<4xf32>
    %49 = vector.multi_reduction <add>, %48, %cst_21 [1] : vector<4x4xf32> to vector<4xf32>
    %50 = vector.shape_cast %49 : vector<4xf32> to vector<4x1xf32>
    %51 = math.log %50 : vector<4x1xf32>
    %52 = arith.addf %45, %51 : vector<4x1xf32>
    %cst_22 = arith.constant dense<0xFF800000> : vector<4xf32>
    %53 = vector.multi_reduction <maximumf>, %43, %cst_22 [0] : vector<4x4xf32> to vector<4xf32>
    %54 = vector.shape_cast %53 : vector<4xf32> to vector<1x4xf32>
    %55 = vector.broadcast %54 : vector<1x4xf32> to vector<4x4xf32>
    %56 = arith.subf %43, %55 : vector<4x4xf32>
    %57 = math.exp %56 : vector<4x4xf32>
    %cst_23 = arith.constant dense<0.000000e+00> : vector<4xf32>
    %58 = vector.multi_reduction <add>, %57, %cst_23 [0] : vector<4x4xf32> to vector<4xf32>
    %59 = vector.shape_cast %58 : vector<4xf32> to vector<1x4xf32>
    %60 = math.log %59 : vector<1x4xf32>
    %61 = arith.addf %54, %60 : vector<1x4xf32>
    %62 = vector.shape_cast %52 : vector<4x1xf32> to vector<1x4x1xf32>
    %cst_24 = arith.constant dense<0.000000e+00> : vector<1xf32>
    %63 = vector.multi_reduction <add>, %62, %cst_24 [1, 2] : vector<1x4x1xf32> to vector<1xf32>
    %64 = vector.shape_cast %63 : vector<1xf32> to vector<1x1x1xf32>
    %65 = vector.extract %64[0, 0, 0] : f32 from vector<1x1x1xf32>
    %66 = vector.broadcast %65 : f32 to vector<1x1xf32>
    %67 = arith.subf %66, %38 : vector<1x1xf32>
    %cst_25 = arith.constant 4.000000e+00 : f32
    %68 = vector.broadcast %cst_25 : f32 to vector<1x1xf32>
    %69 = arith.divf %67, %68 : vector<1x1xf32>
    %70 = vector.shape_cast %61 : vector<1x4xf32> to vector<1x1x4xf32>
    %cst_26 = arith.constant dense<0.000000e+00> : vector<1xf32>
    %71 = vector.multi_reduction <add>, %70, %cst_26 [1, 2] : vector<1x1x4xf32> to vector<1xf32>
    %72 = vector.shape_cast %71 : vector<1xf32> to vector<1x1x1xf32>
    %73 = vector.extract %72[0, 0, 0] : f32 from vector<1x1x1xf32>
    %74 = vector.broadcast %73 : f32 to vector<1x1xf32>
    %75 = arith.subf %74, %38 : vector<1x1xf32>
    %cst_27 = arith.constant 4.000000e+00 : f32
    %76 = vector.broadcast %cst_27 : f32 to vector<1x1xf32>
    %77 = arith.divf %75, %76 : vector<1x1xf32>
    %c0_28 = arith.constant 0 : index
    %c0_29 = arith.constant 0 : index
    %78 = vector.load %arg8[%c0_28, %c0_29] : memref<1x1xf32, #tpu.memory_space<vmem>>, vector<1x1xf32>
    tpu.vector_store %arg8[%c0_28, %c0_29], %69 {strides = array<i32>} : memref<1x1xf32, #tpu.memory_space<vmem>>, vector<1x1xf32>,
    %79 = arith.addf %69, %77 : vector<1x1xf32>
    %cst_30 = arith.constant 5.000000e-01 : f32
    %80 = vector.broadcast %cst_30 : f32 to vector<1x1xf32>
    %81 = arith.mulf %80, %79 : vector<1x1xf32>
    %c0_31 = arith.constant 0 : index
    %c0_32 = arith.constant 0 : index
    %82 = vector.load %arg7[%c0_31, %c0_32] : memref<1x1xf32, #tpu.memory_space<vmem>>, vector<1x1xf32>
    tpu.vector_store %arg7[%c0_31, %c0_32], %81 {strides = array<i32>} : memref<1x1xf32, #tpu.memory_space<vmem>>, vector<1x1xf32>,
    return
  }
}

</mosaic_0001>

<bundles_post_ra>
// kernel: tpu_custom_call.1
= control target key start
LH: loop header
LB: loop body
LE: loop exit
PB: predicated region body
PF: predicated region fallthrough
CT: control target
= control target key end

     0   :  { %15 = vsyncpa [#allocation4], 0  ;;  %v475_v1 = vmov 0.0   ;;  %vm476_vm0 = vmmov 0   ;;  %s588_s0 = inlined_call_operand.vmem [shape: bf16[4,32], index: 0, kind: input, shape index: {}]   ;;  %s589_s1 = inlined_call_operand.vmem [shape: bf16[4,32], index: 1, kind: input, shape index: {}]   ;;  %s590_s2 = inlined_call_operand.vmem [shape: bf16[32,16], index: 2, kind: input, shape index: {}]   ;;  %s591_s3 = inlined_call_operand.vmem [shape: f32[1,16], index: 3, kind: input, shape index: {}]   ;;  %s592_s4 = inlined_call_operand.vmem [shape: bf16[32,16], index: 4, kind: input, shape index: {}]   ;;  %s593_s5 = inlined_call_operand.vmem [shape: f32[1,16], index: 5, kind: input, shape index: {}]   ;;  %s594_s6 = inlined_call_operand.<no memory space> [shape: f32[1], index: 6, kind: input, shape index: {}]   ;;  %s595_s7 = inlined_call_operand.hbm [shape: f32[1,1], index: 7, kind: output, shape index: {0}]   ;;  %s596_s8 = inlined_call_operand.hbm [shape: f32[1,1], index: 8, kind: output, shape index: {1}]  }
   0x1   :  { %v407_v0 = vld [vmem:[%s592_s4] sm:$0xff]   ;;  %383 = vmatprep.subr.bf16.mxu1 %v475_v1  ;;  %375 = vmatprep.subr.bf16.mxu0 %v475_v1  ;;  %v409_v3 = vld [vmem:[%s592_s4 + $0x8] sm:$0xff]  }
   0x2   :  { %v408_v2 = vld [vmem:[%s590_s2] sm:$0xff]   ;;  %384 = vmatpush3.bf16.msra.mxu1 %v407_v0  ;;  %387 = vmatprep.mubr.msk.bf16.mxu1 %vm476_vm0, %v475_v1  ;;  %v410_v4 = vld [vmem:[%s590_s2 + $0x8] sm:$0xff]  }
   0x3   :  { %385 = vmatprep.subr.bf16.mxu1 %v475_v1  ;;  %376 = vmatpush3.bf16.msra.mxu0 %v408_v2 }
   0x4   :  { %377 = vmatprep.subr.bf16.mxu0 %v475_v1  ;;  %379 = vmatprep.mubr.msk.bf16.mxu0 %vm476_vm0, %v475_v1 }
   0x5   :  { %16 = vsyncpa [#allocation6], 0  ;;  %vm57_vm1 = vcmask 261120   ;;  %v101_v5 = vld [vmem:[%s589_s1] sm:$0x3]  ;;  %vm169_vm2 = vcmask 125952   ;;  %v201_v46 = vstv %s594_s6 }
   0x6   :  { %386 = vmatpush3.bf16.msra.mxu1 %v409_v3  ;;  %v33_v6 = vld [vmem:[%s588_s0] sm:$0x3]  ;;  %vm217_vm7 = vcmask 130048   ;;  %vm265_vm8 = vcmask 27648   ;;  %vm203_vm9 = vcmask 3072   ;;  %vm311_vm10 = vcmask 24576  }
   0x7   :  { %378 = vmatpush3.bf16.msra.mxu0 %v410_v4  ;;  %v362_v7 = vld [vmem:[%s593_s5] ss:$0 sm:$0xff]  ;;  %s477_s19 = smov [#allocation5]   ;;  %vm325_vm11 = vcmask 0   ;;  %s478_s21 = smov [#allocation3]  }
   0x8   :  { %391 = vmatprep.subr.bf16.mxu0 %v475_v1  ;;  %v358_v8 = vld [vmem:[%s591_s3] ss:$0 sm:$0xff]  ;;  %s346_s20 = sshll.u32 %s477_s19, 4  ;;  %s336_s22 = sshll.u32 %s478_s21, 4  ;;  %s347_s20 = int_to_ptr.vmem [resolvable:$true] %s346_s20  ;;  %s337_s22 = int_to_ptr.vmem [resolvable:$true] %s336_s22 }
   0x9   :  { %388 = vmatmul.mubr.msk.bf16.vlgmr.msra.gmra.mrb[0].mxu1 %vm57_vm1, %v101_v5  ;;  %s427_s23 = scalar_lea.vmem %s347_s20, 16  ;;  %s431_s24 = scalar_lea.vmem %s347_s20, 32 }
   0xa   :  { %380 = vmatmul.mubr.msk.bf16.vlgmr.msra.gmra.mrb[0].mxu0 %vm57_vm1, %v33_v6  ;;  %p428_p0 = scmp.ne.s32.totalorder %s347_s20, %s427_s23  ;;  %p432_p1 = scmp.lt.s32.totalorder %s347_s20, %s347_s20 }
   0xb   :  { %393 = vmatprep.mubr.msk.bf16.mxu0 %vm476_vm0, %v475_v1  ;;  %p433_p2 = scmp.lt.s32.totalorder %s431_s24, %s427_s23 }
   0xd   :  { %p434_p3 = por %p433_p2, %p432_p1 }
   0xf   :  { %p435_p4 = pnand %p434_p3, %p428_p0 }
  0xdc   :  { %v162_v9 = vpop.f32.mrb[0].mxu1 }
  0xdd   :  { %v163_v10 = vadd.f32 %v362_v7, %v162_v9  ;;  %v389_v11 = vpop.f32.mrb[1].mxu1  ;;  %v95_v12 = vpop.f32.mrb[0].mxu0 }
  0xde   :  { %v165_v13 = vpop.f32.mrb[2].mxu1  ;;  %v96_v14 = vadd.f32 %v358_v8, %v95_v12  ;;  %v381_v15 = vpop.f32.mrb[1].mxu0 }
  0xdf   :  { %v390_v16 = vpop.f32.mrb[3].mxu1  ;;  %v183_v17 = vmul.f32 %v163_v10, %v163_v10  ;;  %v98_v18 = vpop.f32.mrb[2].mxu0 }
  0xe0   :  { %v382_v19 = vpop.f32.mrb[3].mxu0  ;;  %v168_v20 = vmul.f32 %v96_v14, %v96_v14 }
  0xe1   :  { %v184_v21 = vsel %vm169_vm2, %v183_v17, 0.0 }
  0xe2   :  { %185 = vadd.xlane.f32.xlu0 %v184_v21  ;;  %v170_v22 = vsel %vm169_vm2, %v168_v20, 0.0 }
  0xe6   :  { %171 = vadd.xlane.f32.xlu0 %v170_v22 }
 0x16f   :  { %v186_v23 = vpop.xlane.xlu0 %185 }
 0x170   :  { %411 = vrsqrt.f32 %v186_v23  ;;  %vm189_vm3 = vcmp.eq.f32.partialorder %v186_v23, inf  ;;  %v192_v27 = vand.u32 2147483648, %v186_v23  ;;  %vm191_vm4 = vcmp.eq.f32.partialorder %v186_v23, 0.0 }
 0x173   :  { %v172_v24 = vpop.xlane.xlu0 %171 }
 0x174   :  { %413 = vrsqrt.f32 %v172_v24  ;;  %vm175_vm5 = vcmp.eq.f32.partialorder %v172_v24, inf  ;;  %v178_v33 = vand.u32 2147483648, %v172_v24  ;;  %vm177_vm6 = vcmp.eq.f32.partialorder %v172_v24, 0.0 }
 0x17a   :  { %v412_v25 = vpop.eup %411 }
 0x17b   :  { %v188_v26 = vmul.f32 %v412_v25, %v186_v23 }
 0x17d   :  { %v190_v28 = vsel %vm189_vm3, %v186_v23, %v188_v26 }
 0x17e   :  { %v414_v29 = vpop.eup %413  ;;  %v193_v30 = vsel %vm191_vm4, %v192_v27, %v190_v28 }
 0x17f   :  { %v194_v31 = vmax.f32 %v193_v30, 1e-12  ;;  %v174_v32 = vmul.f32 %v414_v29, %v172_v24 }
 0x181   :  { %415 = vrcp.f32 %v194_v31  ;;  %v176_v34 = vsel %vm175_vm5, %v172_v24, %v174_v32 }
 0x182   :  { %v179_v35 = vsel %vm177_vm6, %v178_v33, %v176_v34 }
 0x183   :  { %v180_v36 = vmax.f32 %v179_v35, 1e-12 }
 0x185   :  { %417 = vrcp.f32 %v180_v36 }
 0x18b   :  { %v416_v37 = vpop.eup %415 }
 0x18c   :  { %v196_v38 = vmul.f32 %v416_v37, %v163_v10 }
 0x18e   :  { %v216_v39 = vpack.c.bf16 %v196_v38, %v196_v38 }
 0x18f   :  { %v418_v40 = vpop.eup %417 }
 0x190   :  { %v222_v41 = vsel %vm217_vm7, %v216_v39, 0  ;;  %v182_v42 = vmul.f32 %v418_v40, %v96_v14 }
 0x191   :  { %392 = vmatpush3.bf16.xpose.msra.mxu0 %v222_v41 }
 0x192   :  { %v197_v43 = vmul.f32 %v196_v38, %v182_v42  ;;  %v215_v45 = vpack.c.bf16 %v182_v42, %v182_v42 }
 0x194   :  { %v198_v44 = vsel %vm169_vm2, %v197_v43, 0.0 }
 0x195   :  { %199 = vadd.xlane.f32.xlu0 %v198_v44 }
 0x198   :  { %394 = vmatmul.mubr.msk.bf16.vlgmr.msra.gmra.mrb[4].mxu0 %vm217_vm7, %v215_v45 }
 0x222   :  { %v200_v9 = vpop.xlane.xlu0 %199 }
 0x223   :  { %v202_v11 = vmul.f32 %v201_v46, %v200_v9 }
 0x225   :  { %v204_v14 = vsel %vm203_vm9, %v202_v11, 0.0 }
 0x26b   :  { %v258_v47 = vpop.f32.mrb[4].mxu0 }
 0x26c   :  { %v264_v48 = vmul.f32 %v258_v47, %v201_v46  ;;  %v395_v49 = vpop.f32.mrb[5].mxu0 }
 0x26d   :  { %v261_v50 = vpop.f32.mrb[6].mxu0 }
 0x26e   :  { %v396_v51 = vpop.f32.mrb[7].mxu0  ;;  %v266_v52 = vsel %vm265_vm8, %v264_v48, -inf }
 0x26f   :  { %267 = vmax.xlane.f32.xlu1 %v266_v52  ;;  %v278_v53 = vrot.slane %v266_v52, 4 }
 0x271   :  { %v279_v54 = vmax.f32 %v266_v52, %v278_v53 }
 0x273   :  { %v280_v55 = vrot.slane %v279_v54, 2 }
 0x275   :  { %v281_v56 = vmax.f32 %v279_v54, %v280_v55 }
 0x277   :  { %v282_v57 = vrot.slane %v281_v56, 1 }
 0x279   :  { %v283_v58 = vmax.f32 %v281_v56, %v282_v57 }
 0x27b   :  { %v284_v59 = vsub.f32 %v264_v48, %v283_v58 }
 0x27d   :  { %v285_v60 = vmul.f32 1.442695, %v284_v59 }
 0x27f   :  { %419 = vpow2.f32 %v285_v60 }
 0x289   :  { %v420_v61 = vpop.eup %419 }
 0x28a   :  { %v287_v62 = vsel %vm265_vm8, %v420_v61, 0.0 }
 0x28b   :  { %v288_v63 = vrot.slane %v287_v62, 4 }
 0x28d   :  { %v289_v0 = vadd.f32 %v288_v63, %v287_v62 }
 0x28f   :  { %v290_v1 = vrot.slane %v289_v0, 2 }
 0x291   :  { %v291_v2 = vadd.f32 %v290_v1, %v289_v0 }
 0x293   :  { %v292_v3 = vrot.slane %v291_v2, 1 }
 0x295   :  { %v293_v4 = vadd.f32 %v292_v3, %v291_v2 }
 0x297   :  { %421 = vlog2.f32 %v293_v4 }
 0x2a1   :  { %v422_v8 = vpop.eup %421 }
 0x2a2   :  { %v295_v13 = vmul.f32 0.6931472, %v422_v8 }
 0x2a4   :  { %v296_v15 = vadd.f32 %v295_v13, %v283_v58 }
 0x2a6   :  { %v312_v16 = vsel %vm311_vm10, %v296_v15, 0.0 }
 0x2fc   :  { %v268_v5 = vpop.xlane.xlu1 %267 }
 0x2fd   :  { %v269_v6 = vsub.f32 %v264_v48, %v268_v5 }
 0x2ff   :  { %v270_v7 = vmul.f32 1.442695, %v269_v6 }
 0x301   :  { %423 = vpow2.f32 %v270_v7 }
 0x30b   :  { %v424_v10 = vpop.eup %423 }
 0x30c   :  { %v272_v12 = vsel %vm265_vm8, %v424_v10, 0.0 }
 0x30d   :  { %273 = vadd.xlane.f32.xlu1 %v272_v12 }
 0x311   :  { %205 = vadd.xlane.f32.xlu1 %v204_v14 }
 0x315   :  { %313 = vadd.xlane.f32.xlu1 %v312_v16 }
 0x39a   :  { %v274_v17 = vpop.xlane.xlu1 %273 }
 0x39b   :  { %425 = vlog2.f32 %v274_v17 }
 0x39e   :  { %v206_v18 = vpop.xlane.xlu1 %205 }
 0x39f   :  { %v207_v19 = vrot.slane %v206_v18, 4 }
 0x3a1   :  { %v208_v20 = vadd.f32 %v207_v19, %v206_v18 }
 0x3a2   :  { %v314_v29 = vpop.xlane.xlu1 %313 }
 0x3a3   :  { %v209_v21 = vrot.slane %v208_v20, 2  ;;  %v315_v30 = vrot.slane %v314_v29, 4 }
 0x3a5   :  { %v426_v22 = vpop.eup %425  ;;  %v210_v23 = vadd.f32 %v209_v21, %v208_v20  ;;  %v316_v31 = vadd.f32 %v315_v30, %v314_v29 }
 0x3a6   :  { %v276_v24 = vmul.f32 0.6931472, %v426_v22 }
 0x3a7   :  { %v211_v25 = vrot.slane %v210_v23, 1  ;;  %v317_v32 = vrot.slane %v316_v31, 2 }
 0x3a8   :  { %v277_v26 = vadd.f32 %v276_v24, %v268_v5 }
 0x3a9   :  { %v212_v27 = vadd.f32 %v211_v25, %v210_v23  ;;  %v318_v36 = vadd.f32 %v317_v32, %v316_v31 }
 0x3aa   :  { %v297_v28 = vsel %vm203_vm9, %v277_v26, 0.0 }
 0x3ab   :  { %298 = vadd.xlane.f32.xlu0 %v297_v28  ;;  %397 = vpush %v212_v27  ;;  %v319_v39 = vrot.slane %v318_v36, 1 }
 0x3ad   :  { %v320_v42 = vadd.f32 %v319_v39, %v318_v36 }
 0x3dc   :  { %s398_s3 = spop %397 }
 0x3dd   :  { %v214_v43 = vstv %s398_s3 }
 0x438   :  { %v299_v33 = vpop.xlane.xlu0 %298 }
 0x439   :  { %v300_v34 = vrot.slane %v299_v33, 4 }
 0x43b   :  { %v301_v35 = vadd.f32 %v300_v34, %v299_v33 }
 0x43d   :  { %v302_v37 = vrot.slane %v301_v35, 2 }
 0x43f   :  { %v303_v38 = vadd.f32 %v302_v37, %v301_v35 }
 0x441   :  { %v304_v40 = vrot.slane %v303_v38, 1 }
 0x443   :  { %v305_v41 = vadd.f32 %v304_v40, %v303_v38 }
 0x445   :  { %399 = vpush %v305_v41 }
 0x446   :  { %401 = vpush %v320_v42 }
 0x476   :  { %s400_s5 = spop %399 }
 0x477   :  { %v307_v44 = vstv %s400_s5  ;;  %s402_s6 = spop %401 }
 0x478   :  { %v308_v45 = vsub.f32 %v307_v44, %v214_v43  ;;  %v322_v46 = vstv %s402_s6 }
 0x479   :  { %v323_v47 = vsub.f32 %v322_v46, %v214_v43 }
 0x47a   :  { %v310_v48 = vmul.f32 0.25, %v308_v45 }
 0x47b   :  { %v324_v49 = vmul.f32 0.25, %v323_v47 }
 0x47c   :  { %326 = vst.msk [vmem:[#allocation5] sm:$0x1] %vm325_vm11, %v310_v48 }
 0x47d   :  { %v327_v50 = vadd.f32 %v324_v49, %v310_v48 }
 0x47e   :  { %438 = shalt.err (!%p435_p4)
}
 0x47f   :  { %s439_s27 = scalar_lea.hbm %s596_s8, 16 }
 0x480   :  { %p440_p5 = scmp.ne.s32.totalorder %s596_s8, %s439_s27  ;;  %p443_p6 = scmp.lt.u32.totalorder %s439_s27, %s596_s8 }
 0x482   :  { %p445_p7 = pnand %p443_p6, %p440_p5 }
 0x484   :  { %448 = shalt.err (!%p445_p7)
}
 0x485   :  { %349 = dma.vmem_to_hbm [thread:$0]  %s347_s20, 16, %s596_s8, [#allocation6]   ;;  %v328_v51 = vmul.f32 0.5, %v327_v50 }
 0x486   :  { %s449_s12 = scalar_lea.vmem %s337_s22, 16  ;;  %s453_s13 = scalar_lea.vmem %s337_s22, 32 }
 0x487   :  { %329 = vst.msk [vmem:[#allocation3] sm:$0x1] %vm325_vm11, %v328_v51  ;;  %p450_p8 = scmp.ne.s32.totalorder %s337_s22, %s449_s12  ;;  %p454_p9 = scmp.lt.s32.totalorder %s337_s22, %s337_s22 }
 0x488   :  { %p455_p10 = scmp.lt.s32.totalorder %s453_s13, %s449_s12 }
 0x48a   :  { %p456_p11 = por %p455_p10, %p454_p9 }
 0x48c   :  { %p457_p12 = pnand %p456_p11, %p450_p8 }
 0x48e   :  { %460 = shalt.err (!%p457_p12)
}
 0x48f   :  { %s461_s15 = scalar_lea.hbm %s595_s7, 16 }
 0x490   :  { %p462_p13 = scmp.ne.s32.totalorder %s595_s7, %s461_s15  ;;  %p465_p0 = scmp.lt.u32.totalorder %s461_s15, %s595_s7 }
 0x492   :  { %p467_p1 = pnand %p465_p0, %p462_p13 }
 0x494   :  { %470 = shalt.err (!%p467_p1)
}
 0x495   :  { %339 = dma.vmem_to_hbm [thread:$0]  %s337_s22, 16, %s595_s7, [#allocation4]  }
 0x496   :  { %471 = dma.done.wait [#allocation4], 16  }
 0x497   :  { %472 = vsyncadd [#allocation4], 4294967280 }
 0x498   :  { %473 = dma.done.wait [#allocation6], 16  }
 0x499   :  { %474 = vsyncadd [#allocation6], 4294967280 }
 0x49a   :  { %356 = vsyncpa [#allocation4], 1 }
 0x49b   :  { %357 = vsyncpa [#allocation6], 1 }

</bundles_post_ra>
